<compile_context>
chip_gen: v7x
topology: tpu7x:2x2x1
jax: 0.10.0
libtpu: 0.0.40
codegen_flags: <defaults>
</compile_context>

<pallas_src>
import jax
import jax.numpy as jnp
from jax.experimental import pallas as pl
from jax.experimental.pallas import tpu as pltpu

GRIDLESS_MAX = 1024   # up to this many rows: single gridless call, all-resident
B_TILE = 512          # batch tile for the grid path (engaged only when B > GRIDLESS_MAX)


def _linear_kernel(x_ref, w_ref, b_ref, o_ref):
    # MXU matmul (f32 accumulate, full precision) + VPU bias add.
    acc = jnp.dot(
        x_ref[...], w_ref[...],
        preferred_element_type=jnp.float32,
        precision=jax.lax.Precision.HIGHEST,
    )
    o_ref[...] = (acc + b_ref[...]).astype(o_ref.dtype)


def prepare_params(w, b):
    """One-time parameter prep.

    w: PyTorch-layout weight (out_features, in_features)
    b: bias (out_features,)
    Returns (w_t, b_2d): (in, out) transposed weight and (1, out) bias, ready
    to be passed to `mapping_forward` on every call. No padding — the kernel
    streams native-width tiles.
    """
    w_t = jnp.asarray(w).T            # (in_features, out_features)
    b_2d = jnp.asarray(b).reshape(1, -1)
    return w_t, b_2d


def mapping_forward(x, w_t, b_2d):
    """y = x @ W.T + b (PyTorch nn.Linear semantics) via a Pallas TPU kernel."""
    B, f_in = x.shape
    f_out = w_t.shape[1]

    if B <= GRIDLESS_MAX:
        # Small/medium batch: single invocation, no grid, everything resident
        # in VMEM, x fed unpadded (full-array blocks are always legal).
        return pl.pallas_call(
            _linear_kernel,
            out_shape=jax.ShapeDtypeStruct((B, f_out), x.dtype),
            in_specs=[
                pl.BlockSpec(memory_space=pltpu.MemorySpace.VMEM),
                pl.BlockSpec(memory_space=pltpu.MemorySpace.VMEM),
                pl.BlockSpec(memory_space=pltpu.MemorySpace.VMEM),
            ],
            out_specs=pl.BlockSpec(memory_space=pltpu.MemorySpace.VMEM),
        )(x, w_t, b_2d)

    # Large batch: tile the batch dim (ragged last tile handled by Pallas edge
    # masking), keep weight/bias resident, mark the batch axis parallel so v7x
    # shards it across both TensorCores.  B > GRIDLESS_MAX => grid >= 3 steps.
    grid = (pl.cdiv(B, B_TILE),)
    return pl.pallas_call(
        _linear_kernel,
        out_shape=jax.ShapeDtypeStruct((B, f_out), x.dtype),
        grid=grid,
        in_specs=[
            pl.BlockSpec((B_TILE, f_in), lambda i: (i, 0)),
            pl.BlockSpec((f_in, f_out), lambda i: (0, 0)),
            pl.BlockSpec((1, f_out), lambda i: (0, 0)),
        ],
        out_specs=pl.BlockSpec((B_TILE, f_out), lambda i: (i, 0)),
        compiler_params=pltpu.CompilerParams(
            dimension_semantics=("parallel",),
        ),
    )(x, w_t, b_2d)


mapping_forward_jit = jax.jit(mapping_forward)


if __name__ == "__main__":
    scale = 2
    feat = int(9 * scale * scale * 2.5)   # 90
    batch = 2

    key = jax.random.PRNGKey(0)
    kx, kw, kb, kx2 = jax.random.split(key, 4)

    # Deterministic params, same scheme as PyTorch default init:
    # U(-1/sqrt(fan_in), 1/sqrt(fan_in)); weight stored PyTorch-style (out, in).
    bound = 1.0 / (feat ** 0.5)
    w = jax.random.uniform(kw, (feat, feat), jnp.float32, -bound, bound)
    b = jax.random.uniform(kb, (feat,), jnp.float32, -bound, bound)
    x = jax.random.normal(kx, (batch, feat), jnp.float32)

    # One-time parameter prep (transpose weight, reshape bias).
    w_t, b_2d = prepare_params(w, b)

    # --- small-batch (gridless) path ---
    y = mapping_forward_jit(x, w_t, b_2d)
    y = jax.block_until_ready(y)
    y_ref = x @ w.T + b
    assert y.shape == (batch, feat)
    assert jnp.allclose(y, y_ref, atol=1e-5, rtol=1e-5)

    # --- large-batch (grid) path with a ragged last tile ---
    big_batch = 1300   # cdiv(1300, 512) = 3 grid steps, last tile partial
    x_big = jax.random.normal(kx2, (big_batch, feat), jnp.float32)
    y_big = mapping_forward_jit(x_big, w_t, b_2d)
    y_big = jax.block_until_ready(y_big)
    y_big_ref = x_big @ w.T + b
    assert y_big.shape == (big_batch, feat)
    assert jnp.allclose(y_big, y_big_ref, atol=1e-5, rtol=1e-5)

    print("KERNEL_OK")
</pallas_src>

<mosaic_0001>
module attributes {stable_mosaic.version = 11 : i64} {
  func.func @_linear_kernel(%arg0: memref<2x90xf32, #tpu.memory_space<vmem>>, %arg1: memref<90x90xf32, #tpu.memory_space<vmem>>, %arg2: memref<1x90xf32, #tpu.memory_space<vmem>>, %arg3: memref<2x90xf32, #tpu.memory_space<vmem>>) attributes {dimension_semantics = [], scalar_prefetch = 0 : i64, scratch_operands = 0 : i64, tpu.core_type = #tpu.core_type<tc>} {
    %c0 = arith.constant 0 : index
    %c0_0 = arith.constant 0 : index
    %0 = vector.load %arg0[%c0, %c0_0] : memref<2x90xf32, #tpu.memory_space<vmem>>, vector<2x90xf32>
    %c0_1 = arith.constant 0 : index
    %c0_2 = arith.constant 0 : index
    %1 = vector.load %arg1[%c0_1, %c0_2] : memref<90x90xf32, #tpu.memory_space<vmem>>, vector<90x90xf32>
    %cst = arith.constant dense<0.000000e+00> : vector<2x90xf32>
    %2 = tpu.matmul %0, %1, %cst {dimension_numbers = #tpu.dot_dimension_numbers<[1], [0], [0], [1], [0, 0, 1, 1], [], []>, precision = #tpu.contract_precision<fp32>} : vector<2x90xf32>, vector<90x90xf32>, vector<2x90xf32> -> vector<2x90xf32>
    %c0_3 = arith.constant 0 : index
    %c0_4 = arith.constant 0 : index
    %3 = vector.load %arg2[%c0_3, %c0_4] : memref<1x90xf32, #tpu.memory_space<vmem>>, vector<1x90xf32>
    %4 = vector.broadcast %3 : vector<1x90xf32> to vector<2x90xf32>
    %5 = arith.addf %2, %4 : vector<2x90xf32>
    %c0_5 = arith.constant 0 : index
    %c0_6 = arith.constant 0 : index
    %6 = vector.load %arg3[%c0_5, %c0_6] : memref<2x90xf32, #tpu.memory_space<vmem>>, vector<2x90xf32>
    tpu.vector_store %arg3[%c0_5, %c0_6], %5 {strides = array<i32>} : memref<2x90xf32, #tpu.memory_space<vmem>>, vector<2x90xf32>,
    return
  }
}

</mosaic_0001>

<bundles_post_ra>
// kernel: mapping_forward.1
= control target key start
LH: loop header
LB: loop body
LE: loop exit
PB: predicated region body
PF: predicated region fallthrough
CT: control target
= control target key end

     0   :  { %8 = vsyncpa [#allocation3], 0  ;;  %s1338_s0 = inlined_call_operand.hbm [shape: f32[2,90], index: 0, kind: input, shape index: {}]   ;;  %s1339_s1 = inlined_call_operand.hbm [shape: f32[90,90], index: 1, kind: input, shape index: {}]   ;;  %s1340_s2 = inlined_call_operand.vmem [shape: f32[1,90], index: 2, kind: input, shape index: {}]   ;;  %s1341_s3 = inlined_call_operand.hbm [shape: f32[2,90], index: 3, kind: output, shape index: {}]  }
   0x1   :  { %9 = vsyncpa [#allocation6], 0 }
   0x2   :  { %10 = vsyncpa [#allocation4], 0  ;;  %s1115_s12 = smov [#allocation2]   ;;  %s1116_s14 = smov [#allocation5]  }
   0x3   :  { %s17_s13 = sshll.u32 %s1115_s12, 4  ;;  %s26_s15 = sshll.u32 %s1116_s14, 4  ;;  %s18_s13 = int_to_ptr.vmem [resolvable:$true] %s17_s13  ;;  %s1143_s15 = int_to_ptr.vmem [resolvable:$true] %s26_s15 }
   0x4   :  { %s1043_s18 = scalar_lea.hbm %s1338_s0, 32 }
   0x5   :  { %p1044_p0 = scmp.ne.s32.totalorder %s1338_s0, %s1043_s18  ;;  %p1047_p1 = scmp.lt.u32.totalorder %s1043_s18, %s1338_s0 }
   0x7   :  { %p1049_p2 = pnand %p1047_p1, %p1044_p0 }
   0x9   :  { %1052 = shalt.err (!%p1049_p2)
}
   0xa   :  { %s1053_s23 = scalar_lea.vmem %s18_s13, 32  ;;  %p1058_p4 = scmp.lt.s32.totalorder %s18_s13, %s18_s13 }
   0xb   :  { %p1054_p3 = scmp.ne.s32.totalorder %s18_s13, %s1053_s23  ;;  %p1059_p5 = scmp.lt.s32.totalorder %s1053_s23, %s1053_s23 }
   0xd   :  { %p1060_p6 = por %p1059_p5, %p1058_p4 }
   0xf   :  { %p1061_p7 = pnand %p1060_p6, %p1054_p3 }
  0x11   :  { %1064 = shalt.err (!%p1061_p7)
}
  0x12   :  { %20 = dma.hbm_to_vmem [thread:$0]  %s1338_s0, 32, %s18_s13, [#allocation3]  }
  0x13   :  { %s1065_s28 = scalar_lea.hbm %s1339_s1, 1536 }
  0x14   :  { %p1066_p8 = scmp.ne.s32.totalorder %s1339_s1, %s1065_s28  ;;  %p1069_p9 = scmp.lt.u32.totalorder %s1065_s28, %s1339_s1 }
  0x16   :  { %p1071_p10 = pnand %p1069_p9, %p1066_p8 }
  0x18   :  { %1074 = shalt.err (!%p1071_p10)
}
  0x19   :  { %s1075_s6 = scalar_lea.vmem %s1143_s15, 1536  ;;  %p1080_p12 = scmp.lt.s32.totalorder %s1143_s15, %s1143_s15 }
  0x1a   :  { %p1076_p11 = scmp.ne.s32.totalorder %s1143_s15, %s1075_s6  ;;  %p1081_p13 = scmp.lt.s32.totalorder %s1075_s6, %s1075_s6 }
  0x1c   :  { %p1082_p0 = por %p1081_p13, %p1080_p12 }
  0x1e   :  { %p1083_p1 = pnand %p1082_p0, %p1076_p11 }
  0x20   :  { %1086 = shalt.err (!%p1083_p1)
}
  0x21   :  { %s1117_s0 = smov 128   ;;  %s1118_s7 = smov 8  }
  0x22   :  { %32 = dma.hbm_to_vmem [thread:$0]  %s1339_s1, 1536, %s1143_s15, [#allocation6], %s1117_s0, %s1117_s0, %s1118_s7  }
  0x23   :  { %1109 = dma.done.wait [#allocation3], 32  }
  0x24   :  { %1110 = vsyncadd [#allocation3], 4294967264 }
  0x25   :  { %1111 = dma.done.wait [#allocation6], 1536  }
  0x26   :  { %1112 = vsyncadd [#allocation6], 4294965760  ;;  %v1119_v0 = vmov 0.0|0.0   ;;  %vm1120_vm0 = vmmov 0   ;;  %v1121_v1 = vmov 0.0   ;;  %v42_v2 = vld [vmem:[#allocation5] sm:$0xff] }
  0x27   :  { %917 = vmatprep.subr.bf16.mxu1 %v1119_v0  ;;  %971 = vmatprep.subr.bf16.mxu0 %v1119_v0  ;;  %v43_v3 = vld [vmem:[#allocation5 + $0x8] sm:$0xff]  ;;  %v44_v4 = vld [vmem:[#allocation5 + $0x10] sm:$0xff]  ;;  %v70_v5 = vand.u32 4294901760, %v42_v2  ;;  %v45_v7 = vld [vmem:[#allocation5 + $0x18] sm:$0xff]  ;;  %vm61_vm1 = vcmask 736256   ;;  %vm65_vm2 = vcmask 1041408  }
  0x28   :  { %779 = vmatprep.mubr.msk.f32.mxu1 %vm1120_vm0, %v1121_v1  ;;  %860 = vmatprep.mubr.msk.f32.mxu0 %vm1120_vm0, %v1121_v1  ;;  %v73_v6 = vand.u32 4294901760, %v43_v3  ;;  %v76_v8 = vand.u32 4294901760, %v44_v4  ;;  %v79_v9 = vand.u32 4294901760, %v45_v7  ;;  %v46_v10 = vld [vmem:[#allocation5 + $0x20] sm:$0xff]  ;;  %v47_v11 = vld [vmem:[#allocation5 + $0x28] sm:$0xff]  ;;  %v48_v17 = vld [vmem:[#allocation5 + $0x30] sm:$0xff] }
  0x29   :  { %v41_v13 = vld [vmem:[#allocation2] sm:$0x3]  ;;  %v82_v15 = vand.u32 4294901760, %v46_v10  ;;  %v85_v16 = vand.u32 4294901760, %v47_v11  ;;  %v1188_v20 = vsub.f32 %v42_v2, %v70_v5  ;;  %v88_v23 = vand.u32 4294901760, %v48_v17  ;;  %v50_v25 = vld [vmem:[#allocation5 + $0x40] sm:$0xff] }
  0x2a   :  { %v1180_v12 = vpack.c.bf16 %v73_v6, %v70_v5  ;;  %v1184_v14 = vpack.c.bf16 %v79_v9, %v76_v8  ;;  %v49_v18 = vld [vmem:[#allocation5 + $0x38] sm:$0xff]  ;;  %v63_v19 = vsel %vm61_vm1, %v41_v13, 0  ;;  %v1190_v21 = vsub.f32 %v43_v3, %v73_v6  ;;  %v51_v26 = vld [vmem:[#allocation5 + $0x48] sm:$0xff]  ;;  %v52_v35 = vld [vmem:[#allocation5 + $0x50] sm:$0xff]  ;;  %s1122_s11 = smov [#allocation7]  }
  0x2b   :  { %v1194_v22 = vpack.c.bf16 %v85_v16, %v82_v15  ;;  %v91_v24 = vand.u32 4294901760, %v49_v18  ;;  %v1196_v27 = vand.u32 4294901760, %v63_v19  ;;  %v53_v28 = vld [vmem:[#allocation5 + $0x58] sm:$0x3]  ;;  %v1200_v29 = vsub.f32 %v44_v4, %v76_v8  ;;  %s666_s12 = sshll.u32 %s1122_s11, 4  ;;  %s667_s12 = int_to_ptr.vmem [resolvable:$true] %s666_s12 }
  0x2c   :  { %919 = vmatpush3.bf16.msra.mxu1 %v1180_v12  ;;  %973 = vmatpush3.bf16.msra.mxu0 %v1180_v12  ;;  %v1202_v30 = vsub.f32 %v45_v7, %v79_v9  ;;  %v94_v31 = vand.u32 4294901760, %v50_v25  ;;  %v97_v32 = vand.u32 4294901760, %v51_v26  ;;  %v67_v36 = vsel %vm65_vm2, %v53_v28, 0  ;;  %s1087_s13 = scalar_lea.vmem %s667_s12, 32  ;;  %p1092_p3 = scmp.lt.s32.totalorder %s667_s12, %s667_s12 }
  0x2d   :  { %920 = vmatprep.subr.bf16.mxu1 %v1119_v0  ;;  %974 = vmatprep.subr.bf16.mxu0 %v1119_v0  ;;  %v1205_v33 = vsub.f32 %v63_v19, %v1196_v27  ;;  %v1209_v34 = vpack.c.bf16 %v91_v24, %v88_v23  ;;  %v159_v37 = vand.u32 4294901760, %v1188_v20  ;;  %v166_v38 = vand.u32 4294901760, %v1190_v21  ;;  %p1088_p2 = scmp.ne.s32.totalorder %s667_s12, %s1087_s13  ;;  %p1093_p4 = scmp.lt.s32.totalorder %s1087_s13, %s1087_s13 }
  0x2e   :  { %v1215_v39 = vsub.f32 %v46_v10, %v82_v15  ;;  %v1217_v40 = vsub.f32 %v47_v11, %v85_v16  ;;  %v100_v41 = vand.u32 4294901760, %v52_v35  ;;  %v103_v42 = vand.u32 4294901760, %v67_v36 }
  0x2f   :  { %v148_v43 = vand.u32 4294901760, %v1205_v33  ;;  %v173_v44 = vand.u32 4294901760, %v1200_v29  ;;  %v1223_v45 = vpack.c.bf16 %v97_v32, %v94_v31  ;;  %v160_v46 = vsub.f32 %v1188_v20, %v159_v37  ;;  %p1094_p5 = por %p1093_p4, %p1092_p3 }
  0x30   :  { %922 = vmatpush3.bf16.msra.mxu1 %v1184_v14  ;;  %976 = vmatpush3.bf16.msra.mxu0 %v1184_v14  ;;  %v167_v47 = vsub.f32 %v1190_v21, %v166_v38  ;;  %v180_v48 = vand.u32 4294901760, %v1202_v30  ;;  %v1230_v49 = vsub.f32 %v48_v17, %v88_v23  ;;  %v1232_v50 = vsub.f32 %v49_v18, %v91_v24 }
  0x31   :  { %923 = vmatprep.subr.bf16.mxu1 %v1119_v0  ;;  %977 = vmatprep.subr.bf16.mxu0 %v1119_v0  ;;  %v1234_v51 = vpack.c.bf16 %v103_v42, %v100_v41  ;;  %v149_v52 = vsub.f32 %v1205_v33, %v148_v43  ;;  %v174_v53 = vsub.f32 %v1200_v29, %v173_v44  ;;  %v187_v54 = vand.u32 4294901760, %v1215_v39  ;;  %p1095_p6 = pnand %p1094_p5, %p1088_p2 }
  0x32   :  { %v161_v55 = vand.u32 4294901760, %v160_v46  ;;  %v168_v56 = vand.u32 4294901760, %v167_v47  ;;  %v181_v57 = vsub.f32 %v1202_v30, %v180_v48  ;;  %v194_v58 = vand.u32 4294901760, %v1217_v40 }
  0x33   :  { %v1245_v59 = vsub.f32 %v50_v25, %v94_v31  ;;  %v1247_v60 = vsub.f32 %v51_v26, %v97_v32  ;;  %v990_v61 = vpack.c.bf16 %v166_v38, %v159_v37  ;;  %v150_v62 = vand.u32 4294901760, %v149_v52 }
  0x34   :  { %925 = vmatpush3.bf16.msra.mxu1 %v1194_v22  ;;  %979 = vmatpush3.bf16.msra.mxu0 %v1194_v22  ;;  %v175_v63 = vand.u32 4294901760, %v174_v53  ;;  %v188_v2 = vsub.f32 %v1215_v39, %v187_v54  ;;  %v201_v3 = vand.u32 4294901760, %v1230_v49  ;;  %v936_v4 = vpack.c.bf16 %v168_v56, %v161_v55 }
  0x35   :  { %926 = vmatprep.subr.bf16.mxu1 %v1119_v0  ;;  %980 = vmatprep.subr.bf16.mxu0 %v1119_v0  ;;  %v182_v5 = vand.u32 4294901760, %v181_v57  ;;  %v195_v6 = vsub.f32 %v1217_v40, %v194_v58  ;;  %v208_v7 = vand.u32 4294901760, %v1232_v50  ;;  %v1257_v8 = vsub.f32 %v52_v35, %v100_v41 }
  0x36   :  { %v1259_v9 = vsub.f32 %v67_v36, %v103_v42  ;;  %v993_v10 = vpack.c.bf16 %v180_v48, %v173_v44  ;;  %v189_v11 = vand.u32 4294901760, %v188_v2  ;;  %v202_v13 = vsub.f32 %v1230_v49, %v201_v3 }
  0x37   :  { %v215_v15 = vand.u32 4294901760, %v1245_v59  ;;  %v939_v16 = vpack.c.bf16 %v182_v5, %v175_v63  ;;  %v196_v17 = vand.u32 4294901760, %v195_v6  ;;  %v209_v18 = vsub.f32 %v1232_v50, %v208_v7 }
  0x38   :  { %928 = vmatpush3.bf16.msra.mxu1 %v1209_v34  ;;  %982 = vmatpush3.bf16.msra.mxu0 %v1209_v34  ;;  %v222_v19 = vand.u32 4294901760, %v1247_v60  ;;  %v996_v23 = vpack.c.bf16 %v194_v58, %v187_v54  ;;  %v203_v24 = vand.u32 4294901760, %v202_v13  ;;  %v229_v26 = vand.u32 4294901760, %v1257_v8 }
  0x39   :  { %929 = vmatprep.subr.bf16.mxu1 %v1119_v0  ;;  %983 = vmatprep.subr.bf16.mxu0 %v1119_v0  ;;  %v216_v25 = vsub.f32 %v1245_v59, %v215_v15  ;;  %v942_v28 = vpack.c.bf16 %v196_v17, %v189_v11  ;;  %v210_v31 = vand.u32 4294901760, %v209_v18  ;;  %v236_v35 = vand.u32 4294901760, %v1259_v9 }
  0x3a   :  { %v223_v32 = vsub.f32 %v1247_v60, %v222_v19  ;;  %v999_v36 = vpack.c.bf16 %v208_v7, %v201_v3  ;;  %v230_v37 = vsub.f32 %v1257_v8, %v229_v26  ;;  %v1002_v46 = vpack.c.bf16 %v222_v19, %v215_v15 }
  0x3b   :  { %v945_v38 = vpack.c.bf16 %v210_v31, %v203_v24  ;;  %v217_v41 = vand.u32 4294901760, %v216_v25  ;;  %v1005_v53 = vpack.c.bf16 %v236_v35, %v229_v26  ;;  %v954_v54 = vpack.c.bf16 %v1190_v21, %v1188_v20  ;;  %v676_v21 = vld [vmem:[%s1340_s2] ss:$0 sm:$0xff] }
  0x3c   :  { %931 = vmatpush3.bf16.msra.mxu1 %v1223_v45  ;;  %985 = vmatpush3.bf16.msra.mxu0 %v1223_v45  ;;  %v224_v42 = vand.u32 4294901760, %v223_v32  ;;  %v231_v47 = vand.u32 4294901760, %v230_v37  ;;  %v957_v55 = vpack.c.bf16 %v1202_v30, %v1200_v29  ;;  %v960_v20 = vpack.c.bf16 %v1217_v40, %v1215_v39 }
  0x3d   :  { %932 = vmatprep.subr.bf16.mxu1 %v1119_v0  ;;  %986 = vmatprep.subr.bf16.mxu0 %v1119_v0  ;;  %vm658_vm3 = vcmask 730112  }
  0x3e   :  { %v948_v44 = vpack.c.bf16 %v224_v42, %v217_v41 }
  0x40   :  { %934 = vmatpush3.bf16.msra.mxu1 %v1234_v51  ;;  %988 = vmatpush3.bf16.msra.mxu0 %v1234_v51 }
  0x41   :  { %935 = vmatprep.subr.bf16.mxu1 %v1119_v0  ;;  %989 = vmatprep.subr.bf16.mxu0 %v1119_v0 }
  0x43   :  { %780 = vmatmul.mubr.f32.vlgmr.msra.gmra.mrb[0].mxu1 %v150_v62  ;;  %861 = vmatmul.mubr.f32.vlgmr.msra.gmra.mrb[0].mxu0 %v148_v43  ;;  %v237_v43 = vsub.f32 %v1259_v9, %v236_v35 }
  0x44   :  { %937 = vmatpush3.bf16.msra.mxu1 %v936_v4  ;;  %991 = vmatpush3.bf16.msra.mxu0 %v990_v61 }
  0x45   :  { %938 = vmatprep.subr.bf16.mxu1 %v1119_v0  ;;  %992 = vmatprep.subr.bf16.mxu0 %v1119_v0  ;;  %v238_v48 = vand.u32 4294901760, %v237_v43 }
  0x46   :  { %806 = vmatprep.mubr.msk.f32.mxu1 %vm1120_vm0, %v1121_v1  ;;  %887 = vmatprep.mubr.msk.f32.mxu0 %vm1120_vm0, %v1121_v1 }
  0x47   :  { %v951_v52 = vpack.c.bf16 %v238_v48, %v231_v47 }
  0x48   :  { %940 = vmatpush3.bf16.msra.mxu1 %v939_v16  ;;  %994 = vmatpush3.bf16.msra.mxu0 %v993_v10 }
  0x49   :  { %941 = vmatprep.subr.bf16.mxu1 %v1119_v0  ;;  %995 = vmatprep.subr.bf16.mxu0 %v1119_v0 }
  0x4c   :  { %943 = vmatpush3.bf16.msra.mxu1 %v942_v28  ;;  %997 = vmatpush3.bf16.msra.mxu0 %v996_v23 }
  0x4d   :  { %944 = vmatprep.subr.bf16.mxu1 %v1119_v0  ;;  %998 = vmatprep.subr.bf16.mxu0 %v1119_v0 }
  0x50   :  { %946 = vmatpush3.bf16.msra.mxu1 %v945_v38  ;;  %1000 = vmatpush3.bf16.msra.mxu0 %v999_v36 }
  0x51   :  { %947 = vmatprep.subr.bf16.mxu1 %v1119_v0  ;;  %1001 = vmatprep.subr.bf16.mxu0 %v1119_v0 }
  0x54   :  { %949 = vmatpush3.bf16.msra.mxu1 %v948_v44  ;;  %1003 = vmatpush3.bf16.msra.mxu0 %v1002_v46 }
  0x55   :  { %950 = vmatprep.subr.bf16.mxu1 %v1119_v0  ;;  %1004 = vmatprep.subr.bf16.mxu0 %v1119_v0 }
  0x58   :  { %952 = vmatpush3.bf16.msra.mxu1 %v951_v52  ;;  %1006 = vmatpush3.bf16.msra.mxu0 %v1005_v53 }
  0x59   :  { %953 = vmatprep.subr.bf16.mxu1 %v1119_v0  ;;  %1007 = vmatprep.subr.bf16.mxu0 %v1119_v0 }
  0x5b   :  { %807 = vmatmul.mubr.f32.vlgmr.msra.gmra.mrb[0].mxu1 %v1196_v27  ;;  %888 = vmatmul.mubr.f32.vlgmr.msra.gmra.mrb[0].mxu0 %v1196_v27 }
  0x5c   :  { %955 = vmatpush3.bf16.msra.mxu1 %v954_v54  ;;  %1009 = vmatpush3.bf16.msra.mxu0 %v1180_v12  ;;  %v963_v12 = vpack.c.bf16 %v1232_v50, %v1230_v49 }
  0x5d   :  { %956 = vmatprep.subr.bf16.mxu1 %v1119_v0  ;;  %1010 = vmatprep.subr.bf16.mxu0 %v1119_v0 }
  0x5e   :  { %833 = vmatprep.mubr.msk.f32.mxu1 %vm1120_vm0, %v1121_v1  ;;  %914 = vmatprep.mubr.msk.f32.mxu0 %vm1120_vm0, %v1121_v1  ;;  %v966_v1 = vpack.c.bf16 %v1247_v60, %v1245_v59 }
  0x60   :  { %958 = vmatpush3.bf16.msra.mxu1 %v957_v55  ;;  %1012 = vmatpush3.bf16.msra.mxu0 %v1184_v14  ;;  %v969_v14 = vpack.c.bf16 %v1259_v9, %v1257_v8 }
  0x61   :  { %959 = vmatprep.subr.bf16.mxu1 %v1119_v0  ;;  %1013 = vmatprep.subr.bf16.mxu0 %v1119_v0 }
  0x64   :  { %961 = vmatpush3.bf16.msra.mxu1 %v960_v20  ;;  %1015 = vmatpush3.bf16.msra.mxu0 %v1194_v22 }
  0x65   :  { %962 = vmatprep.subr.bf16.mxu1 %v1119_v0  ;;  %1016 = vmatprep.subr.bf16.mxu0 %v1119_v0 }
  0x68   :  { %964 = vmatpush3.bf16.msra.mxu1 %v963_v12  ;;  %1018 = vmatpush3.bf16.msra.mxu0 %v1209_v34 }
  0x69   :  { %965 = vmatprep.subr.bf16.mxu1 %v1119_v0  ;;  %1019 = vmatprep.subr.bf16.mxu0 %v1119_v0 }
  0x6c   :  { %967 = vmatpush3.bf16.msra.mxu1 %v966_v1  ;;  %1021 = vmatpush3.bf16.msra.mxu0 %v1223_v45 }
  0x6d   :  { %968 = vmatprep.subr.bf16.mxu1 %v1119_v0  ;;  %1022 = vmatprep.subr.bf16.mxu0 %v1119_v0 }
  0x70   :  { %970 = vmatpush3.bf16.msra.mxu1 %v969_v14  ;;  %1024 = vmatpush3.bf16.msra.mxu0 %v1234_v51 }
  0x73   :  { %834 = vmatmul.mubr.f32.vlgmr.msra.gmra.mrb[0].mxu1 %v1205_v33  ;;  %915 = vmatmul.mubr.f32.vlgmr.msra.gmra.mrb[0].mxu0 %v1196_v27 }
 0x146   :  { %v379_v22 = vpop.f32.mrb[0].mxu1  ;;  %v654_v29 = vpop.f32.mrb[0].mxu0 }
 0x147   :  { %v1025_v30 = vadd.f32 %v676_v21, %v379_v22  ;;  %v835_v34 = vpop.f32.mrb[1].mxu1  ;;  %v916_v39 = vpop.f32.mrb[1].mxu0 }
 0x149   :  { %v1026_v0 = vadd.f32 %v1025_v30, %v654_v29 }
 0x14b   :  { %659 = vst.msk [vmem:[#allocation7] sm:$0x3] %vm658_vm3, %v1026_v0 }
 0x14c   :  { %1098 = shalt.err (!%p1095_p6)
}
 0x14d   :  { %s1099_s15 = scalar_lea.hbm %s1341_s3, 32 }
 0x14e   :  { %p1100_p7 = scmp.ne.s32.totalorder %s1341_s3, %s1099_s15  ;;  %p1103_p8 = scmp.lt.u32.totalorder %s1099_s15, %s1341_s3 }
 0x150   :  { %p1105_p9 = pnand %p1103_p8, %p1100_p7 }
 0x152   :  { %1108 = shalt.err (!%p1105_p9)
}
 0x153   :  { %669 = dma.vmem_to_hbm [thread:$0]  %s667_s12, 32, %s1341_s3, [#allocation4]  }
 0x154   :  { %1113 = dma.done.wait [#allocation4], 32  }
 0x155   :  { %1114 = vsyncadd [#allocation4], 4294967264 }
 0x156   :  { %673 = vsyncpa [#allocation3], 1 }
 0x157   :  { %674 = vsyncpa [#allocation6], 1 }
 0x158   :  { %675 = vsyncpa [#allocation4], 1 }

</bundles_post_ra>
